<compile_context>
chip_gen: v7x
topology: tpu7x:2x2x1
jax: 0.10.0
libtpu: 0.0.40
codegen_flags: <defaults>
</compile_context>

<pallas_src>
import functools
import math

import jax
import jax.numpy as jnp
import numpy as np
from jax.experimental import pallas as pl
from jax.experimental.pallas import tpu as pltpu


def _posenc_kernel(x_ref, o_ref, *, frequency_bands, include_input):
    """One lane-dense tile of positional encoding.

    x_ref : (in_dim,  TN)  transposed input points (points along lanes)
    o_ref : (out_dim, TN)  transposed encoded output
    """
    in_dim = x_ref.shape[0]
    x = x_ref[...].astype(jnp.float32)                      # (in_dim, TN), f32 math

    base = 0
    if include_input:
        # Identity copy: plain full-lane store, no sin/mask work.
        o_ref[pl.ds(0, in_dim), :] = x.astype(o_ref.dtype)
        base = in_dim

    # Trace-time-unrolled loop over frequency bands; scale is a Python constant so
    # there is no table load, no broadcast, and no lane concatenate. Each iteration
    # is one VPU multiply + one EUP sin + one EUP cos over a full-lane slab, followed
    # by two full-lane stores at static sublane offsets.
    for f in range(frequency_bands):
        t = x * (math.pi * (2.0 ** f))
        o_ref[pl.ds(base, in_dim), :] = jnp.sin(t).astype(o_ref.dtype)
        o_ref[pl.ds(base + in_dim, in_dim), :] = jnp.cos(t).astype(o_ref.dtype)
        base += 2 * in_dim


def positional_encoding(x, frequency_bands=6, include_input=True,
                        block_cols=8192, transposed_output=False):
    """Pallas TPU forward of PositionalEncoding.

    x: (..., in_dim) -> (..., out_dim)               (transposed_output=False, default)
                     -> (out_dim, prod(leading))     (transposed_output=True, lane-dense)
    """
    orig_shape = x.shape
    in_dim = int(orig_shape[-1])
    n_rows = int(np.prod(orig_shape[:-1])) if len(orig_shape) > 1 else 1
    n_copies = 2 * frequency_bands + (1 if include_input else 0)
    out_dim = in_dim * n_copies

    # ---- lane-dense shaping: points along the lane (last) axis ----------------
    x2t = x.reshape(n_rows, in_dim).T                        # (in_dim, n_rows)

    # Tile width: multiple of 128; shrink for small inputs so no work is wasted,
    # cap at block_cols for large ones (sweepable; ~1.3 MiB output tile at 8192).
    tn = min(int(block_cols), pl.cdiv(n_rows, 128) * 128)
    tn = max(128, (tn // 128) * 128)
    n_pad = pl.cdiv(n_rows, tn) * tn
    if n_pad != n_rows:
        x2t = jnp.pad(x2t, ((0, 0), (0, n_pad - n_rows)))

    kernel = functools.partial(_posenc_kernel,
                               frequency_bands=frequency_bands,
                               include_input=include_input)

    out_t = pl.pallas_call(
        kernel,
        out_shape=jax.ShapeDtypeStruct((out_dim, n_pad), x.dtype),
        grid=(n_pad // tn,),
        in_specs=[
            pl.BlockSpec((in_dim, tn), lambda i: (0, i)),    # full sublane extent, lane tile
        ],
        out_specs=pl.BlockSpec((out_dim, tn), lambda i: (0, i)),
        compiler_params=pltpu.CompilerParams(
            dimension_semantics=("parallel",)),
    )(x2t)

    out_t = out_t[:, :n_rows]                                # drop lane padding
    if transposed_output:
        # Lane-dense slab for consumers that fuse the following matmul as W @ out^T.
        return out_t
    # TODO(synk): downstream decoders should consume the transposed slab directly to
    # avoid this wrapper-side HBM transpose back to (..., out_dim).
    return out_t.T.reshape(*orig_shape[:-1], out_dim)


def _reference(x, frequency_bands=6, include_input=True):
    """Plain-JAX mirror of the PyTorch forward (sin/cos per frequency, concatenated)."""
    freqs = 2.0 ** np.arange(frequency_bands, dtype=np.float32)
    parts = [x] if include_input else []
    for f in freqs:
        parts.append(jnp.sin(x * float(f) * math.pi))
        parts.append(jnp.cos(x * float(f) * math.pi))
    return jnp.concatenate(parts, axis=-1)


if __name__ == "__main__":
    # Small NeRF-like shapes: 2 rays x 128 samples of 3-D points, 6 frequency bands.
    B, P, D, F = 2, 128, 3, 6
    key = jax.random.PRNGKey(0)
    x = jax.random.uniform(key, (B, P, D), dtype=jnp.float32, minval=-1.0, maxval=1.0)

    out = positional_encoding(x, frequency_bands=F, include_input=True)
    out = jax.block_until_ready(out)
    ref = _reference(x, frequency_bands=F, include_input=True)
    assert out.shape == (B, P, D * (1 + 2 * F)), out.shape
    assert jnp.allclose(out, ref, atol=1e-5, rtol=1e-5), \
        float(jnp.max(jnp.abs(out - ref)))

    # include_input=False path.
    out_nf = jax.block_until_ready(
        positional_encoding(x, frequency_bands=F, include_input=False))
    ref_nf = _reference(x, frequency_bands=F, include_input=False)
    assert out_nf.shape == (B, P, 2 * F * D), out_nf.shape
    assert jnp.allclose(out_nf, ref_nf, atol=1e-5, rtol=1e-5), \
        float(jnp.max(jnp.abs(out_nf - ref_nf)))

    # Lane-dense (transposed) output path used by fused consumers.
    out_t = jax.block_until_ready(
        positional_encoding(x, frequency_bands=F, include_input=True,
                            transposed_output=True))
    assert out_t.shape == (D * (1 + 2 * F), B * P), out_t.shape
    assert jnp.allclose(out_t, ref.reshape(B * P, -1).T, atol=1e-5, rtol=1e-5), \
        float(jnp.max(jnp.abs(out_t - ref.reshape(B * P, -1).T)))

    print("KERNEL_OK")
</pallas_src>

<mosaic_0001>
module attributes {stable_mosaic.version = 11 : i64} {
  func.func @_posenc_kernel(%arg0: i32, %arg1: memref<3x256xf32, #tpu.memory_space<vmem>>, %arg2: memref<39x256xf32, #tpu.memory_space<vmem>>) attributes {dimension_semantics = [#tpu.dimension_semantics<parallel>], iteration_bounds = array<i64: 1>, scalar_prefetch = 0 : i64, scratch_operands = 0 : i64, tpu.core_type = #tpu.core_type<tc>, window_params = [{transform_indices = @transform_0, window_bounds = array<i64: 3, 256>}, {transform_indices = @transform_1, window_bounds = array<i64: 39, 256>}]} {
    %c0 = arith.constant 0 : index
    %c0_0 = arith.constant 0 : index
    %0 = vector.load %arg1[%c0, %c0_0] : memref<3x256xf32, #tpu.memory_space<vmem>>, vector<3x256xf32>
    %c0_1 = arith.constant 0 : index
    %c0_2 = arith.constant 0 : index
    %1 = vector.load %arg2[%c0_1, %c0_2] : memref<39x256xf32, #tpu.memory_space<vmem>>, vector<3x256xf32>
    tpu.vector_store %arg2[%c0_1, %c0_2], %0 {strides = array<i32>} : memref<39x256xf32, #tpu.memory_space<vmem>>, vector<3x256xf32>,
    %cst = arith.constant 3.14159274 : f32
    %2 = vector.broadcast %cst : f32 to vector<3x256xf32>
    %3 = arith.mulf %0, %2 : vector<3x256xf32>
    %4 = math.sin %3 : vector<3x256xf32>
    %c3 = arith.constant 3 : index
    %c0_3 = arith.constant 0 : index
    %5 = vector.load %arg2[%c3, %c0_3] : memref<39x256xf32, #tpu.memory_space<vmem>>, vector<3x256xf32>
    tpu.vector_store %arg2[%c3, %c0_3], %4 {strides = array<i32>} : memref<39x256xf32, #tpu.memory_space<vmem>>, vector<3x256xf32>,
    %6 = math.cos %3 : vector<3x256xf32>
    %c6 = arith.constant 6 : index
    %c0_4 = arith.constant 0 : index
    %7 = vector.load %arg2[%c6, %c0_4] : memref<39x256xf32, #tpu.memory_space<vmem>>, vector<3x256xf32>
    tpu.vector_store %arg2[%c6, %c0_4], %6 {strides = array<i32>} : memref<39x256xf32, #tpu.memory_space<vmem>>, vector<3x256xf32>,
    %cst_5 = arith.constant 6.28318548 : f32
    %8 = vector.broadcast %cst_5 : f32 to vector<3x256xf32>
    %9 = arith.mulf %0, %8 : vector<3x256xf32>
    %10 = math.sin %9 : vector<3x256xf32>
    %c9 = arith.constant 9 : index
    %c0_6 = arith.constant 0 : index
    %11 = vector.load %arg2[%c9, %c0_6] : memref<39x256xf32, #tpu.memory_space<vmem>>, vector<3x256xf32>
    tpu.vector_store %arg2[%c9, %c0_6], %10 {strides = array<i32>} : memref<39x256xf32, #tpu.memory_space<vmem>>, vector<3x256xf32>,
    %12 = math.cos %9 : vector<3x256xf32>
    %c12 = arith.constant 12 : index
    %c0_7 = arith.constant 0 : index
    %13 = vector.load %arg2[%c12, %c0_7] : memref<39x256xf32, #tpu.memory_space<vmem>>, vector<3x256xf32>
    tpu.vector_store %arg2[%c12, %c0_7], %12 {strides = array<i32>} : memref<39x256xf32, #tpu.memory_space<vmem>>, vector<3x256xf32>,
    %cst_8 = arith.constant 12.566371 : f32
    %14 = vector.broadcast %cst_8 : f32 to vector<3x256xf32>
    %15 = arith.mulf %0, %14 : vector<3x256xf32>
    %16 = math.sin %15 : vector<3x256xf32>
    %c15 = arith.constant 15 : index
    %c0_9 = arith.constant 0 : index
    %17 = vector.load %arg2[%c15, %c0_9] : memref<39x256xf32, #tpu.memory_space<vmem>>, vector<3x256xf32>
    tpu.vector_store %arg2[%c15, %c0_9], %16 {strides = array<i32>} : memref<39x256xf32, #tpu.memory_space<vmem>>, vector<3x256xf32>,
    %18 = math.cos %15 : vector<3x256xf32>
    %c18 = arith.constant 18 : index
    %c0_10 = arith.constant 0 : index
    %19 = vector.load %arg2[%c18, %c0_10] : memref<39x256xf32, #tpu.memory_space<vmem>>, vector<3x256xf32>
    tpu.vector_store %arg2[%c18, %c0_10], %18 {strides = array<i32>} : memref<39x256xf32, #tpu.memory_space<vmem>>, vector<3x256xf32>,
    %cst_11 = arith.constant 25.1327419 : f32
    %20 = vector.broadcast %cst_11 : f32 to vector<3x256xf32>
    %21 = arith.mulf %0, %20 : vector<3x256xf32>
    %22 = math.sin %21 : vector<3x256xf32>
    %c21 = arith.constant 21 : index
    %c0_12 = arith.constant 0 : index
    %23 = vector.load %arg2[%c21, %c0_12] : memref<39x256xf32, #tpu.memory_space<vmem>>, vector<3x256xf32>
    tpu.vector_store %arg2[%c21, %c0_12], %22 {strides = array<i32>} : memref<39x256xf32, #tpu.memory_space<vmem>>, vector<3x256xf32>,
    %24 = math.cos %21 : vector<3x256xf32>
    %c24 = arith.constant 24 : index
    %c0_13 = arith.constant 0 : index
    %25 = vector.load %arg2[%c24, %c0_13] : memref<39x256xf32, #tpu.memory_space<vmem>>, vector<3x256xf32>
    tpu.vector_store %arg2[%c24, %c0_13], %24 {strides = array<i32>} : memref<39x256xf32, #tpu.memory_space<vmem>>, vector<3x256xf32>,
    %cst_14 = arith.constant 50.2654839 : f32
    %26 = vector.broadcast %cst_14 : f32 to vector<3x256xf32>
    %27 = arith.mulf %0, %26 : vector<3x256xf32>
    %28 = math.sin %27 : vector<3x256xf32>
    %c27 = arith.constant 27 : index
    %c0_15 = arith.constant 0 : index
    %29 = vector.load %arg2[%c27, %c0_15] : memref<39x256xf32, #tpu.memory_space<vmem>>, vector<3x256xf32>
    tpu.vector_store %arg2[%c27, %c0_15], %28 {strides = array<i32>} : memref<39x256xf32, #tpu.memory_space<vmem>>, vector<3x256xf32>,
    %30 = math.cos %27 : vector<3x256xf32>
    %c30 = arith.constant 30 : index
    %c0_16 = arith.constant 0 : index
    %31 = vector.load %arg2[%c30, %c0_16] : memref<39x256xf32, #tpu.memory_space<vmem>>, vector<3x256xf32>
    tpu.vector_store %arg2[%c30, %c0_16], %30 {strides = array<i32>} : memref<39x256xf32, #tpu.memory_space<vmem>>, vector<3x256xf32>,
    %cst_17 = arith.constant 100.530968 : f32
    %32 = vector.broadcast %cst_17 : f32 to vector<3x256xf32>
    %33 = arith.mulf %0, %32 : vector<3x256xf32>
    %34 = math.sin %33 : vector<3x256xf32>
    %c33 = arith.constant 33 : index
    %c0_18 = arith.constant 0 : index
    %35 = vector.load %arg2[%c33, %c0_18] : memref<39x256xf32, #tpu.memory_space<vmem>>, vector<3x256xf32>
    tpu.vector_store %arg2[%c33, %c0_18], %34 {strides = array<i32>} : memref<39x256xf32, #tpu.memory_space<vmem>>, vector<3x256xf32>,
    %36 = math.cos %33 : vector<3x256xf32>
    %c36 = arith.constant 36 : index
    %c0_19 = arith.constant 0 : index
    %37 = vector.load %arg2[%c36, %c0_19] : memref<39x256xf32, #tpu.memory_space<vmem>>, vector<3x256xf32>
    tpu.vector_store %arg2[%c36, %c0_19], %36 {strides = array<i32>} : memref<39x256xf32, #tpu.memory_space<vmem>>, vector<3x256xf32>,
    return
  }
  func.func @transform_0(%arg0: i32) -> (i32, i32) {
    %c0_i32 = arith.constant 0 : i32
    %c0_i32_0 = arith.constant 0 : i32
    return %c0_i32, %arg0 : i32, i32
  }
  func.func @transform_1(%arg0: i32) -> (i32, i32) {
    %c0_i32 = arith.constant 0 : i32
    %c0_i32_0 = arith.constant 0 : i32
    return %c0_i32, %arg0 : i32, i32
  }
}

</mosaic_0001>

<bundles_post_ra>
// kernel: tpu_custom_call.1
= control target key start
LH: loop header
LB: loop body
LE: loop exit
PB: predicated region body
PF: predicated region fallthrough
CT: control target
= control target key end

     0   :  { %6 = vsyncpa [#allocation3], 0  ;;  %s2151_s0 = inlined_call_operand.hbm [shape: f32[3,256], index: 0, kind: input, shape index: {}]   ;;  %s2152_s1 = inlined_call_operand.hbm [shape: f32[39,256], index: 1, kind: output, shape index: {}]  }
   0x1   :  { %7 = vsyncpa [#allocation4], 0  ;;  %s1540_s6 = smov [#allocation2]   ;;  %s1492_s10 = scalar_lea.hbm %s2151_s0, 128 }
   0x2   :  { %s14_s7 = sshll.u32 %s1540_s6, 4  ;;  %p1493_p0 = scmp.ne.s32.totalorder %s2151_s0, %s1492_s10  ;;  %s15_s7 = int_to_ptr.vmem [resolvable:$true] %s14_s7 }
   0x3   :  { %p1496_p1 = scmp.lt.u32.totalorder %s1492_s10, %s2151_s0 }
   0x5   :  { %p1498_p2 = pnand %p1496_p1, %p1493_p0 }
   0x7   :  { %1501 = shalt.err (!%p1498_p2)
}
   0x8   :  { %s1502_s15 = scalar_lea.vmem %s15_s7, 128  ;;  %p1507_p4 = scmp.lt.s32.totalorder %s15_s7, %s15_s7 }
   0x9   :  { %p1503_p3 = scmp.ne.s32.totalorder %s15_s7, %s1502_s15  ;;  %p1508_p5 = scmp.lt.s32.totalorder %s1502_s15, %s1502_s15 }
   0xb   :  { %p1509_p6 = por %p1508_p5, %p1507_p4 }
   0xd   :  { %p1510_p7 = pnand %p1509_p6, %p1503_p3 }
   0xf   :  { %1513 = shalt.err (!%p1510_p7)
}
  0x10   :  { %17 = dma.hbm_to_vmem [thread:$0]  %s2151_s0, 128, %s15_s7, [#allocation3]  }
  0x11   :  { %1536 = dma.done.wait [#allocation3], 128  }
  0x12   :  { %1537 = vsyncadd [#allocation3], 4294967168  ;;  %v1572_v0 = vld [vmem:[#allocation2] sm:$0x77]  ;;  %v1541_v33 = vmov 683565275  }
  0x13   :  { %25 = vst [vmem:[#allocation5] sm:$0x7] %v1572_v0  ;;  %v23_v1 = vcombine.high %v1572_v0, %v1572_v0  ;;  %v1578_v2 = vmul.f32 3.1415927, %v1572_v0  ;;  %v1581_v3 = vmul.f32 6.2831855, %v1572_v0 }
  0x14   :  { %v1584_v4 = vmul.f32 12.566371, %v1572_v0  ;;  %v1596_v23 = vmul.f32 25.132742, %v1572_v0  ;;  %v1542_v35 = vmov 2475754826  }
  0x15   :  { %26 = vst [vmem:[#allocation5 + $0x8] sm:$0x7] %v23_v1  ;;  %v28_v5 = vand.u32 2147483647, %v1578_v2  ;;  %v31_v6 = vand.u32 2139095040, %v1578_v2  ;;  %v257_v8 = vand.u32 2139095040, %v1581_v3 }
  0x16   :  { %v254_v7 = vand.u32 2147483647, %v1581_v3  ;;  %v478_v13 = vand.u32 2139095040, %v1584_v4  ;;  %v475_v27 = vand.u32 2147483647, %v1584_v4  ;;  %vm30_vm13 = vcmp.lt.s32.totalorder %v1578_v2, 0 }
  0x17   :  { %v32_v9 = vshrl.u32 %v31_v6, 23  ;;  %v35_v10 = vand.u32 8388607, %v28_v5  ;;  %v258_v11 = vshrl.u32 %v257_v8, 23  ;;  %v1543_v37 = vmov 2131351028  }
  0x18   :  { %v261_v12 = vand.u32 8388607, %v254_v7  ;;  %v479_v16 = vshrl.u32 %v478_v13, 23  ;;  %v1544_v39 = vmov 2102212464   ;;  %s1547_s0 = smov [#allocation5]  }
  0x19   :  { %v1385_v14 = vadd.s32 4294967169, %v32_v9  ;;  %v1393_v15 = vadd.s32 4294967169, %v258_v11  ;;  %v36_v18 = vor.u32 8388608, %v35_v10  ;;  %v1545_v41 = vmov 920167782   ;;  %s1373_s18 = sshll.u32 %s1547_s0, 4  ;;  %s1374_s18 = int_to_ptr.vmem [resolvable:$true] %s1373_s18 }
  0x1a   :  { %v262_v19 = vor.u32 8388608, %v261_v12  ;;  %v1401_v21 = vadd.s32 4294967169, %v479_v16  ;;  %v1546_v49 = vmov 1326507024   ;;  %vm1710_vm14 = vcmp.le.f32.partialorder %v28_v5, 0.7853982  ;;  %p1519_p9 = scmp.lt.s32.totalorder %s1374_s18, %s1374_s18 }
  0x1b   :  { %v38_v17 = vadd.s32 1, %v1385_v14  ;;  %v264_v20 = vadd.s32 1, %v1393_v15  ;;  %v1599_v28 = vshll.u32 %v36_v18, 8  ;;  %s1514_s19 = scalar_lea.vmem %s1374_s18, 1280 }
  0x1c   :  { %v1601_v30 = vshll.u32 %v262_v19, 8  ;;  %v1603_v31 = vadd.s32 1, %v1401_v21  ;;  %p1515_p8 = scmp.ne.s32.totalorder %s1374_s18, %s1514_s19  ;;  %p1520_p10 = scmp.lt.s32.totalorder %s1514_s19, %s1514_s19 }
  0x1d   :  { %vm39_vm0 = vcmp.gt.s32.totalorder %v38_v17, 0  ;;  %vm265_vm1 = vcmp.gt.s32.totalorder %v264_v20, 0 }
  0x1e   :  { %v40_v22 = vsel %vm39_vm0, %v38_v17, 0  ;;  %v266_v26 = vsel %vm265_vm1, %v264_v20, 0  ;;  %vm486_vm6 = vcmp.gt.s32.totalorder %v1603_v31, 0  ;;  %p1521_p11 = por %p1520_p10, %p1519_p9 }
  0x1f   :  { %v41_v24 = vshrl.u32 %v40_v22, 5  ;;  %v42_v25 = vand.u32 31, %v40_v22  ;;  %v268_v29 = vand.u32 31, %v266_v26  ;;  %v1610_v43 = vshrl.u32 %v266_v26, 5 }
  0x20   :  { %p1522_p12 = pnand %p1521_p11, %p1515_p8 }
  0x21   :  { %v43_v32 = vsub.s32 32, %v42_v25  ;;  %v45_v34 = vshll.u32 %v1541_v33, %v42_v25  ;;  %v48_v36 = vshll.u32 %v1542_v35, %v42_v25  ;;  %v51_v38 = vshll.u32 %v1543_v37, %v42_v25 }
  0x22   :  { %v54_v40 = vshll.u32 %v1544_v39, %v42_v25  ;;  %v57_v42 = vshll.u32 %v1545_v41, %v42_v25  ;;  %vm60_vm2 = vcmp.lt.s32.totalorder %v41_v24, 1  ;;  %vm61_vm3 = vcmp.lt.s32.totalorder %v41_v24, 2 }
  0x23   :  { %v44_v44 = vshrl.u32 %v1541_v33, %v43_v32  ;;  %v46_v45 = vshrl.u32 %v1542_v35, %v43_v32  ;;  %v49_v46 = vshrl.u32 %v1543_v37, %v43_v32  ;;  %v52_v47 = vshrl.u32 %v1544_v39, %v43_v32 }
  0x24   :  { %v55_v48 = vshrl.u32 %v1545_v41, %v43_v32  ;;  %v58_v50 = vshrl.u32 %v1546_v49, %v43_v32  ;;  %vm63_vm4 = vcmp.lt.s32.totalorder %v41_v24, 4  ;;  %v269_v54 = vsub.s32 32, %v268_v29 }
  0x25   :  { %v47_v51 = vor.u32 %v46_v45, %v45_v34  ;;  %v50_v52 = vor.u32 %v49_v46, %v48_v36  ;;  %v53_v53 = vor.u32 %v52_v47, %v51_v38  ;;  %vm62_vm5 = vcmp.lt.s32.totalorder %v41_v24, 3 }
  0x26   :  { %v56_v55 = vor.u32 %v55_v48, %v54_v40  ;;  %v59_v56 = vor.u32 %v58_v50, %v57_v42  ;;  %v271_v57 = vshll.u32 %v1541_v33, %v268_v29  ;;  %v274_v6 = vshll.u32 %v1542_v35, %v268_v29 }
  0x27   :  { %v64_v58 = vsel %vm60_vm2, %v44_v44, %v47_v51  ;;  %v65_v59 = vsel %vm63_vm4, %v53_v53, 2102212464  ;;  %v68_v60 = vsel %vm60_vm2, %v47_v51, %v50_v52  ;;  %v72_v61 = vsel %vm60_vm2, %v50_v52, %v53_v53 }
  0x28   :  { %v66_v62 = vsel %vm62_vm5, %v50_v52, %v65_v59  ;;  %v69_v63 = vsel %vm63_vm4, %v56_v55, 920167782  ;;  %v73_v1 = vsel %vm63_vm4, %v59_v56, 1326507024  ;;  %v270_v10 = vshrl.u32 %v1541_v33, %v269_v54 }
  0x29   :  { %v70_v8 = vsel %vm62_vm5, %v53_v53, %v69_v63  ;;  %v74_v9 = vsel %vm62_vm5, %v56_v55, %v73_v1  ;;  %v272_v11 = vshrl.u32 %v1542_v35, %v269_v54  ;;  %v67_v12 = vsel %vm61_vm3, %v64_v58, %v66_v62 }
  0x2a   :  { %v71_v13 = vsel %vm61_vm3, %v68_v60, %v70_v8  ;;  %v75_v14 = vsel %vm61_vm3, %v72_v61, %v74_v9  ;;  %v275_v15 = vshrl.u32 %v1543_v37, %v269_v54  ;;  %v277_v22 = vshll.u32 %v1543_v37, %v268_v29 }
  0x2b   :  { %v1631_v16 = vmul.u32.u64.low %v1599_v28, %v75_v14  ;;  %v1632_v17 = vmul.u32.u64.high %v1599_v28, %v75_v14, %v1631_v16  ;;  %v1635_v18 = vmul.u32.u64.low %v1599_v28, %v71_v13  ;;  %v1636_v19 = vmul.u32.u64.high %v1599_v28, %v71_v13, %v1635_v18 }
  0x2c   :  { %v273_v20 = vor.u32 %v272_v11, %v271_v57  ;;  %v276_v21 = vor.u32 %v275_v15, %v274_v6  ;;  %v278_v25 = vshrl.u32 %v1544_v39, %v269_v54  ;;  %v280_v24 = vshll.u32 %v1544_v39, %v268_v29 }
  0x2d   :  { %v281_v26 = vshrl.u32 %v1545_v41, %v269_v54  ;;  %v283_v32 = vshll.u32 %v1545_v41, %v268_v29  ;;  %v284_v34 = vshrl.u32 %v1546_v49, %v269_v54  ;;  %v83_v36 = vmul.u32 %v1599_v28, %v67_v12 }
  0x2e   :  { %v279_v38 = vor.u32 %v278_v25, %v277_v22  ;;  %vm286_vm7 = vcmp.lt.s32.totalorder %v1610_v43, 1  ;;  %vm287_vm8 = vcmp.lt.s32.totalorder %v1610_v43, 2  ;;  %vm85_vm9 = vc.u32 %v1632_v17, %v1635_v18 }
  0x2f   :  { %v86_v40 = vadd.s32 1, %v1636_v19  ;;  %v282_v42 = vor.u32 %v281_v26, %v280_v24  ;;  %vm288_vm10 = vcmp.lt.s32.totalorder %v1610_v43, 3  ;;  %v285_v44 = vor.u32 %v284_v34, %v283_v32 }
  0x30   :  { %vm289_vm11 = vcmp.lt.s32.totalorder %v1610_v43, 4  ;;  %v290_v29 = vsel %vm286_vm7, %v270_v10, %v273_v20  ;;  %v294_v45 = vsel %vm286_vm7, %v273_v20, %v276_v21  ;;  %v298_v48 = vsel %vm286_vm7, %v276_v21, %v279_v38 }
  0x31   :  { %v87_v28 = vsel %vm85_vm9, %v86_v40, %v1636_v19  ;;  %v291_v46 = vsel %vm289_vm11, %v279_v38, 2102212464  ;;  %v295_v47 = vsel %vm289_vm11, %v282_v42, 920167782  ;;  %v299_v53 = vsel %vm289_vm11, %v285_v44, 1326507024 }
  0x32   :  { %v88_v50 = vadd.s32 %v87_v28, %v83_v36  ;;  %v292_v51 = vsel %vm288_vm10, %v276_v21, %v291_v46  ;;  %v296_v52 = vsel %vm288_vm10, %v279_v38, %v295_v47  ;;  %v300_v56 = vsel %vm288_vm10, %v282_v42, %v299_v53 }
  0x33   :  { %v293_v54 = vsel %vm287_vm8, %v290_v29, %v292_v51  ;;  %v297_v55 = vsel %vm287_vm8, %v294_v45, %v296_v52  ;;  %v487_v57 = vsel %vm486_vm6, %v1603_v31, 0  ;;  %v301_v59 = vsel %vm287_vm8, %v298_v48, %v300_v56 }
  0x34   :  { %v89_v58 = vadd.s32 536870912, %v88_v50  ;;  %v1664_v60 = vmul.u32.u64.low %v1601_v30, %v297_v55  ;;  %v1665_v61 = vmul.u32.u64.high %v1601_v30, %v297_v55, %v1664_v60  ;;  %v482_v1 = vand.u32 8388607, %v475_v27 }
  0x35   :  { %v1669_v62 = vmul.u32.u64.low %v1601_v30, %v301_v59  ;;  %v1670_v63 = vmul.u32.u64.high %v1601_v30, %v301_v59, %v1669_v62  ;;  %v489_v8 = vand.u32 31, %v487_v57  ;;  %v309_v31 = vmul.u32 %v1601_v30, %v293_v54 }
  0x36   :  { %v90_v6 = vshrl.u32 %v89_v58, 30  ;;  %v704_v9 = vand.u32 2139095040, %v1596_v23  ;;  %v312_v10 = vadd.s32 1, %v1665_v61  ;;  %v483_v11 = vor.u32 8388608, %v482_v1 }
  0x37   :  { %vm311_vm12 = vc.u32 %v1670_v63, %v1664_v60  ;;  %v701_v12 = vand.u32 2147483647, %v1596_v23  ;;  %v490_v15 = vsub.s32 32, %v489_v8  ;;  %v1685_v20 = vmul.f32 50.265484, %v1572_v0 }
  0x38   :  { %v91_v43 = vshll.u32 %v90_v6, 30  ;;  %v313_v14 = vsel %vm311_vm12, %v312_v10, %v1665_v61  ;;  %v705_v19 = vshrl.u32 %v704_v9, 23  ;;  %v1688_v21 = vmul.f32 100.53097, %v1572_v0 }
  0x39   :  { %v314_v16 = vadd.s32 %v313_v14, %v309_v31  ;;  %v1691_v25 = vshrl.u32 %v487_v57, 5  ;;  %v1693_v24 = vshll.u32 %v483_v11, 8  ;;  %v1697_v26 = vand.u32 8388607, %v701_v12 }
  0x3a   :  { %v1680_v13 = vsub.s32 %v88_v50, %v91_v43  ;;  %v84_v32 = vadd.s32 %v1635_v18, %v1632_v17  ;;  %v498_v36 = vshll.u32 %v1543_v37, %v489_v8  ;;  %v499_v0 = vshrl.u32 %v1544_v39, %v490_v15 }
  0x3b   :  { %v315_v22 = vadd.s32 536870912, %v314_v16  ;;  %v492_v40 = vshll.u32 %v1541_v33, %v489_v8  ;;  %v493_v42 = vshrl.u32 %v1542_v35, %v490_v15  ;;  %v1409_v44 = vadd.s32 4294967169, %v705_v19 }
  0x3c   :  { %v94_v30 = vsub.s32 0, %v1680_v13  ;;  %v495_v18 = vshll.u32 %v1542_v35, %v489_v8  ;;  %v496_v45 = vshrl.u32 %v1543_v37, %v490_v15  ;;  %v501_v28 = vshll.u32 %v1544_v39, %v489_v8 }
  0x3d   :  { %v1704_v38 = vshrl.u32 %v315_v22, 30  ;;  %v502_v47 = vshrl.u32 %v1545_v41, %v490_v15  ;;  %vm507_vm15 = vcmp.lt.s32.totalorder %v1691_v25, 1  ;;  %vm510_vm0 = vcmp.lt.s32.totalorder %v1691_v25, 4 }
  0x3e   :  { %v1386_v34 = vmin.u32 %v94_v30, %v1680_v13  ;;  %v114_v5 = vsub.s32 4, %v90_v6  ;;  %v491_v50 = vshrl.u32 %v1541_v33, %v490_v15  ;;  %v500_v51 = vor.u32 %v499_v0, %v498_v36 }
  0x3f   :  { %v317_v46 = vshll.u32 %v1704_v38, 30  ;;  %v494_v53 = vor.u32 %v493_v42, %v492_v40  ;;  %v504_v54 = vshll.u32 %v1545_v41, %v489_v8  ;;  %v505_v55 = vshrl.u32 %v1546_v49, %v490_v15 }
  0x40   :  { %v96_v17 = vclz %v1386_v34  ;;  %v497_v56 = vor.u32 %v496_v45, %v495_v18  ;;  %v503_v57 = vor.u32 %v502_v47, %v501_v28  ;;  %v512_v58 = vsel %vm510_vm0, %v500_v51, 2102212464 }
  0x41   :  { %v1722_v52 = vsub.s32 %v314_v16, %v317_v46  ;;  %vm508_vm2 = vcmp.lt.s32.totalorder %v1691_v25, 2  ;;  %vm509_vm3 = vcmp.lt.s32.totalorder %v1691_v25, 3  ;;  %v115_v8 = vsel %vm30_vm13, %v114_v5, %v90_v6 }
  0x42   :  { %v1387_v48 = vadd.s32 4294967294, %v96_v17  ;;  %vm256_vm4 = vcmp.lt.s32.totalorder %v1581_v3, 0  ;;  %v506_v43 = vor.u32 %v505_v55, %v504_v54  ;;  %v511_v10 = vsel %vm507_vm15, %v491_v50, %v494_v53 }
  0x43   :  { %v320_v61 = vsub.s32 0, %v1722_v52  ;;  %v513_v11 = vsel %vm509_vm3, %v497_v56, %v512_v58  ;;  %v516_v16 = vsel %vm510_vm0, %v503_v57, 920167782  ;;  %v117_v6 = vsel %vm1710_vm14, 0, %v115_v8 }
  0x44   :  { %vm1388_vm1 = vcmp.lt.s32.totalorder %v1387_v48, 0  ;;  %v310_v19 = vadd.s32 %v1664_v60, %v1670_v63  ;;  %v340_v22 = vsub.s32 4, %v1704_v38  ;;  %vm1751_vm5 = vcmp.le.f32.partialorder %v254_v7, 0.7853982 }
  0x45   :  { %v99_v59 = vsel %vm1388_vm1, 0, %v1387_v48  ;;  %v1394_v9 = vmin.u32 %v320_v61, %v1722_v52  ;;  %v517_v0 = vsel %vm509_vm3, %v500_v51, %v516_v16  ;;  %v519_v40 = vsel %vm507_vm15, %v497_v56, %v500_v51 }
  0x46   :  { %v100_v62 = vsub.s32 32, %v99_v59  ;;  %v101_v1 = vshll.u32 %v1680_v13, %v99_v59  ;;  %v104_v31 = vsub.s32 4294967266, %v99_v59  ;;  %v515_v13 = vsel %vm507_vm15, %v494_v53, %v497_v56 }
  0x47   :  { %v322_v30 = vclz %v1394_v9  ;;  %v514_v60 = vsel %vm508_vm2, %v511_v10, %v513_v11  ;;  %v518_v63 = vsel %vm508_vm2, %v515_v13, %v517_v0  ;;  %v520_v17 = vsel %vm510_vm0, %v506_v43, 1326507024 }
  0x48   :  { %v102_v14 = vshrl.u32 %v84_v32, %v100_v62  ;;  %v105_v15 = vadd.s32 127, %v104_v31  ;;  %v521_v45 = vsel %vm509_vm3, %v503_v57, %v520_v17  ;;  %v711_v28 = vadd.s32 1, %v1409_v44 }
  0x49   :  { %v1395_v42 = vadd.s32 4294967294, %v322_v30  ;;  %v522_v46 = vsel %vm508_vm2, %v519_v40, %v521_v45  ;;  %v1770_v47 = vmul.u32.u64.low %v1693_v24, %v518_v63  ;;  %v1771_v48 = vmul.u32.u64.high %v1693_v24, %v518_v63, %v1770_v47 }
  0x4a   :  { %v103_v34 = vor.u32 %v102_v14, %v101_v1  ;;  %v106_v36 = vshll.u32 %v105_v15, 23  ;;  %v1775_v51 = vmul.u32.u64.low %v1693_v24, %v522_v46  ;;  %v1776_v53 = vmul.u32.u64.high %v1693_v24, %v522_v46, %v1775_v51 }
  0x4b   :  { %vm1396_vm6 = vcmp.lt.s32.totalorder %v1395_v42, 0  ;;  %vm712_vm7 = vcmp.gt.s32.totalorder %v711_v28, 0  ;;  %v341_v25 = vsel %vm256_vm4, %v340_v22, %v1704_v38  ;;  %v530_v57 = vmul.u32 %v1693_v24, %v514_v60 }
  0x4c   :  { %v107_v7 = vor.u32 4788187, %v106_v36  ;;  %v110_v18 = vcvt.s32.f32 %v103_v34  ;;  %v325_v50 = vsel %vm1396_vm6, 0, %v1395_v42  ;;  %v713_v58 = vsel %vm712_vm7, %v711_v28, 0 }
  0x4d   :  { %v326_v54 = vsub.s32 32, %v325_v50  ;;  %v327_v55 = vshll.u32 %v1722_v52, %v325_v50  ;;  %v330_v56 = vsub.s32 4294967266, %v325_v50  ;;  %v121_v59 = vadd.s32 3, %v117_v6 }
  0x4e   :  { %v108_v5 = vand.u32 2147483647, %v107_v7  ;;  %v533_v1 = vadd.s32 1, %v1771_v48  ;;  %vm532_vm8 = vc.u32 %v1776_v53, %v1770_v47  ;;  %v709_v52 = vor.u32 8388608, %v1697_v26 }
  0x4f   :  { %v328_v61 = vshrl.u32 %v310_v19, %v326_v54  ;;  %v331_v62 = vadd.s32 127, %v330_v56  ;;  %v715_v8 = vand.u32 31, %v713_v58  ;;  %v343_v38 = vsel %vm1751_vm5, 0, %v341_v25 }
  0x50   :  { %v111_v44 = vmul.f32 %v110_v18, %v108_v5  ;;  %v534_v24 = vsel %vm532_vm8, %v533_v1, %v1771_v48  ;;  %v1792_v11 = vand.u32 3, %v117_v6  ;;  %v1797_v26 = vand.u32 3, %v121_v59 }
  0x51   :  { %v329_v9 = vor.u32 %v328_v61, %v327_v55  ;;  %v332_v43 = vshll.u32 %v331_v62, 23  ;;  %v535_v14 = vadd.s32 %v534_v24, %v530_v57  ;;  %v716_v15 = vsub.s32 32, %v715_v8 }
  0x52   :  { %v112_v31 = vxor.u32 2147483648, %v111_v44  ;;  %v347_v30 = vadd.s32 3, %v343_v38  ;;  %v1799_v34 = vshrl.u32 %v713_v58, 5  ;;  %v718_v6 = vshll.u32 %v1541_v33, %v715_v8 }
  0x53   :  { %v333_v16 = vor.u32 4788187, %v332_v43  ;;  %v336_v19 = vcvt.s32.f32 %v329_v9  ;;  %v536_v22 = vadd.s32 536870912, %v535_v14  ;;  %v721_v0 = vshll.u32 %v1542_v35, %v715_v8 }
  0x54   :  { %v113_v10 = vsel %vm30_vm13, %v112_v31, %v111_v44  ;;  %v719_v29 = vshrl.u32 %v1542_v35, %v716_v15  ;;  %v722_v42 = vshrl.u32 %v1543_v37, %v716_v15  ;;  %v727_v60 = vshll.u32 %v1544_v39, %v715_v8 }
  0x55   :  { %v116_v13 = vsel %vm1710_vm14, %v1578_v2, %v113_v10  ;;  %v334_v36 = vand.u32 2147483647, %v333_v16  ;;  %v1803_v40 = vshrl.u32 %v536_v22, 30  ;;  %vm124_vm9 = vcmp.eq.s32.totalorder %v1797_v26, 0 }
  0x56   :  { %1468 = vcosq.f32 %v116_v13  ;;  %vm235_vm10 = vcmp.eq.s32.totalorder %v1792_v11, 0  ;;  %vm238_vm11 = vcmp.eq.s32.totalorder %v1792_v11, 2  ;;  %v728_v17 = vshrl.u32 %v1545_v41, %v716_v15 }
  0x57   :  { %1470 = vsinq.f32 %v116_v13  ;;  %v337_v63 = vmul.f32 %v336_v19, %v334_v36  ;;  %vm123_vm12 = vcmp.lt.s32.totalorder %v1797_v26, 2  ;;  %vm127_vm13 = vcmp.eq.s32.totalorder %v1797_v26, 2 }
  0x58   :  { %vm234_vm14 = vcmp.lt.s32.totalorder %v1792_v11, 2  ;;  %v538_v7 = vshll.u32 %v1803_v40, 30  ;;  %v724_v18 = vshll.u32 %v1543_v37, %v715_v8  ;;  %v725_v45 = vshrl.u32 %v1544_v39, %v716_v15 }
  0x59   :  { %vm120_vm15 = vweird.f32 %v1578_v2  ;;  %v338_v28 = vxor.u32 2147483648, %v337_v63  ;;  %v1819_v46 = vand.u32 3, %v347_v30  ;;  %v1821_v48 = vand.u32 3, %v343_v38 }
  0x5a   :  { %vm733_vm0 = vcmp.lt.s32.totalorder %v1799_v34, 1  ;;  %v1824_v5 = vsub.s32 %v535_v14, %v538_v7  ;;  %v720_v50 = vor.u32 %v719_v29, %v718_v6  ;;  %v723_v51 = vor.u32 %v722_v42, %v721_v0 }
  0x5b   :  { %v729_v54 = vor.u32 %v728_v17, %v727_v60  ;;  %v339_v55 = vsel %vm256_vm4, %v338_v28, %v337_v63  ;;  %v730_v56 = vshll.u32 %v1545_v41, %v715_v8  ;;  %v731_v44 = vshrl.u32 %v1546_v49, %v716_v15 }
  0x5c   :  { %vm736_vm1 = vcmp.lt.s32.totalorder %v1799_v34, 4  ;;  %v342_v25 = vsel %vm1751_vm5, %v1581_v3, %v339_v55  ;;  %v541_v57 = vsub.s32 0, %v1824_v5  ;;  %v717_v58 = vshrl.u32 %v1541_v33, %v716_v15 }
  0x5d   :  { %v726_v59 = vor.u32 %v725_v45, %v724_v18  ;;  %1472 = vcosq.f32 %v342_v25  ;;  %v1838_v61 = vadd.s32 %v1770_v47, %v1776_v53  ;;  %vm735_vm2 = vcmp.lt.s32.totalorder %v1799_v34, 3 }
  0x5e   :  { %v1841_v62 = vshll.u32 %v709_v52, 8  ;;  %1474 = vsinq.f32 %v342_v25  ;;  %v1402_v31 = vmin.u32 %v541_v57, %v1824_v5  ;;  %v742_v8 = vsel %vm736_vm1, %v729_v54, 920167782 }
  0x5f   :  { %v738_v32 = vsel %vm736_vm1, %v726_v59, 2102212464  ;;  %vm353_vm3 = vcmp.eq.s32.totalorder %v1819_v46, 2  ;;  %v732_v47 = vor.u32 %v731_v44, %v730_v56  ;;  %vm734_vm5 = vcmp.lt.s32.totalorder %v1799_v34, 2 }
  0x60   :  { %v1469_v1 = vpop.eup %1468  ;;  %v741_v53 = vsel %vm733_vm0, %v720_v50, %v723_v51  ;;  %vm350_vm6 = vcmp.eq.s32.totalorder %v1819_v46, 0  ;;  %vm461_vm7 = vcmp.eq.s32.totalorder %v1821_v48, 0  ;;  %v543_v38 = vclz %v1402_v31 }
  0x61   :  { %v1471_v9 = vpop.eup %1470  ;;  %v128_v43 = vxor.u32 2147483648, %v1469_v1  ;;  %v561_v24 = vsub.s32 4, %v1803_v40  ;;  %v737_v10 = vsel %vm733_vm0, %v717_v58, %v720_v50  ;;  %vm460_vm8 = vcmp.lt.s32.totalorder %v1821_v48, 2 }
  0x62   :  { %v125_v52 = vxor.u32 2147483648, %v1471_v9  ;;  %vm477_vm4 = vcmp.lt.s32.totalorder %v1584_v4, 0  ;;  %v739_v13 = vsel %vm735_vm2, %v723_v51, %v738_v32  ;;  %v743_v16 = vsel %vm735_vm2, %v726_v59, %v742_v8 }
  0x63   :  { %v129_v14 = vsel %vm127_vm13, %v128_v43, %v1471_v9  ;;  %v240_v15 = vsel %vm238_vm11, %v128_v43, %v1471_v9  ;;  %vm346_vm13 = vweird.f32 %v1581_v3  ;;  %v1403_v22 = vadd.s32 4294967294, %v543_v38 }
  0x64   :  { %v126_v19 = vsel %vm124_vm9, %v1469_v1, %v125_v52  ;;  %v237_v30 = vsel %vm235_vm10, %v1469_v1, %v125_v52  ;;  %v744_v36 = vsel %vm734_vm5, %v741_v53, %v743_v16  ;;  %v745_v29 = vsel %vm733_vm0, %v723_v51, %v726_v59 }
  0x65   :  { %v130_v6 = vsel %vm123_vm12, %v126_v19, %v129_v14  ;;  %v241_v0 = vsel %vm234_vm14, %v237_v30, %v240_v15  ;;  %v746_v42 = vsel %vm736_vm1, %v732_v47, 1326507024  ;;  %vm1404_vm9 = vcmp.lt.s32.totalorder %v1403_v22, 0 }
  0x66   :  { %v131_v60 = vsel %vm120_vm15, nan, %v130_v6  ;;  %v242_v63 = vsel %vm120_vm15, nan, %v241_v0  ;;  %v747_v26 = vsel %vm735_vm2, %v729_v54, %v746_v42  ;;  %vm1891_vm10 = vcmp.le.f32.partialorder %v475_v27, 0.7853982 }
  0x67   :  { %v134_v17 = vrot.slane %v131_v60, 5  ;;  %v133_v7 = vcombine.high %v131_v60, %v131_v60  ;;  %v245_v11 = vrot.slane %v242_v63, 2  ;;  %v244_v18 = vcombine.high %v242_v63, %v242_v63  ;;  %v1473_v54 = vpop.eup %1472 }
  0x68   :  { %v546_v28 = vsel %vm1404_vm9, 0, %v1403_v22  ;;  %v748_v50 = vsel %vm734_vm5, %v745_v29, %v747_v26  ;;  %v1898_v2 = vmul.u32.u64.low %v1841_v62, %v744_v36  ;;  %v1899_v51 = vmul.u32.u64.high %v1841_v62, %v744_v36, %v1898_v2  ;;  %v1475_v25 = vpop.eup %1474 }
  0x69   :  { %138 = vst [vmem:[#allocation5] sm:$0x38] %v134_v17  ;;  %v135_v55 = vrot.slane %v133_v7, 5  ;;  %249 = vst [vmem:[#allocation5 + $0x10] ss:$-12 sps:$4 sm:$0xc1] %v245_v11   ;;  %v548_v27 = vshll.u32 %v1824_v5, %v546_v28  ;;  %v1904_v59 = vmul.u32.u64.low %v1841_v62, %v748_v50  ;;  %v1905_v1 = vmul.u32.u64.high %v1841_v62, %v748_v50, %v1904_v59 }
  0x6a   :  { %v246_v56 = vrot.slane %v244_v18, 2  ;;  %v547_v44 = vsub.s32 32, %v546_v28  ;;  %v354_v57 = vxor.u32 2147483648, %v1473_v54  ;;  %v551_v58 = vsub.s32 4294967266, %v546_v28 }
  0x6b   :  { %139 = vst [vmem:[#allocation5 + $0x8] sm:$0x38] %v135_v55  ;;  %vm349_vm11 = vcmp.lt.s32.totalorder %v1819_v46, 2  ;;  %v351_v31 = vxor.u32 2147483648, %v1475_v25  ;;  %v740_v8 = vsel %vm734_vm5, %v737_v10, %v739_v13  ;;  %vm2159_vm12 = vcmp.eq.s32.totalorder %v1821_v48, 2 }
  0x6c   :  { %250 = vst [vmem:[#allocation5 + $0x18] ss:$-12 sps:$4 sm:$0xc1] %v246_v56   ;;  %v549_v32 = vshrl.u32 %v1838_v61, %v547_v44  ;;  %v355_v5 = vsel %vm353_vm3, %v354_v57, %v1475_v25  ;;  %v466_v9 = vsel %vm2159_vm12, %v354_v57, %v1475_v25  ;;  %v552_v43 = vadd.s32 127, %v551_v58 }
  0x6d   :  { %v562_v47 = vsel %vm477_vm4, %v561_v24, %v1803_v40  ;;  %v352_v53 = vsel %vm350_vm6, %v1473_v54, %v351_v31  ;;  %v463_v61 = vsel %vm461_vm7, %v1473_v54, %v351_v31  ;;  %v759_v34 = vadd.s32 1, %v1899_v51 }
  0x6e   :  { %v550_v52 = vor.u32 %v549_v32, %v548_v27  ;;  %v356_v38 = vsel %vm349_vm11, %v352_v53, %v355_v5  ;;  %v467_v10 = vsel %vm460_vm8, %v463_v61, %v466_v9  ;;  %v553_v14 = vshll.u32 %v552_v43, 23 }
  0x6f   :  { %v756_v15 = vmul.u32 %v1841_v62, %v740_v8  ;;  %v357_v13 = vsel %vm346_vm13, nan, %v356_v38  ;;  %v468_v40 = vsel %vm346_vm13, nan, %v467_v10  ;;  %vm758_vm14 = vc.u32 %v1905_v1, %v1898_v2 }
  0x70   :  { %v557_v46 = vcvt.s32.f32 %v550_v52  ;;  %v360_v24 = vrot.slane %v357_v13, 7  ;;  %v359_v16 = vcombine.high %v357_v13, %v357_v13  ;;  %v470_v19 = vcombine.low %v468_v40, %v468_v40  ;;  %473 = vst [vmem:[#allocation5 + $0x18] sm:$0x70] %v468_v40 }
  0x71   :  { %v554_v30 = vor.u32 4788187, %v553_v14  ;;  %v564_v48 = vsel %vm1891_vm10, 0, %v562_v47  ;;  %v760_v62 = vsel %vm758_vm14, %v759_v34, %v1899_v51  ;;  %v925_v22 = vand.u32 2139095040, %v1685_v20 }
  0x72   :  { %364 = vst [vmem:[#allocation5 + $0x10] sm:$0xe] %v360_v24  ;;  %v361_v36 = vrot.slane %v359_v16, 7  ;;  %472 = vst [vmem:[#allocation5 + $0x10] sm:$0x70] %v470_v19  ;;  %v761_v6 = vadd.s32 %v760_v62, %v756_v15  ;;  %v1151_v63 = vand.u32 2139095040, %v1688_v21  ;;  %v757_v9 = vadd.s32 %v1898_v2, %v1905_v1 }
  0x73   :  { %v555_v3 = vand.u32 2147483647, %v554_v30  ;;  %v922_v0 = vand.u32 2147483647, %v1685_v20  ;;  %v926_v29 = vshrl.u32 %v925_v22, 23  ;;  %v568_v26 = vadd.s32 3, %v564_v48 }
  0x74   :  { %365 = vst [vmem:[#allocation5 + $0x18] sm:$0xe] %v361_v36  ;;  %v762_v60 = vadd.s32 536870912, %v761_v6  ;;  %v1942_v51 = vand.u32 3, %v564_v48  ;;  %v1152_v55 = vshrl.u32 %v1151_v63, 23  ;;  %vm703_vm0 = vcmp.lt.s32.totalorder %v1596_v23, 0 }
  0x75   :  { %v558_v42 = vmul.f32 %v557_v46, %v555_v3  ;;  %v1417_v17 = vadd.s32 4294967169, %v926_v29  ;;  %v929_v18 = vand.u32 8388607, %v922_v0  ;;  %v1947_v44 = vand.u32 3, %v568_v26 }
  0x76   :  { %v763_v11 = vshrl.u32 %v762_v60, 30  ;;  %vm687_vm1 = vcmp.eq.s32.totalorder %v1942_v51, 2  ;;  %v1148_v45 = vand.u32 2147483647, %v1688_v21  ;;  %v1425_v32 = vadd.s32 4294967169, %v1152_v55 }
  0x77   :  { %v559_v7 = vxor.u32 2147483648, %v558_v42  ;;  %v932_v28 = vadd.s32 1, %v1417_v17  ;;  %v930_v25 = vor.u32 8388608, %v929_v18  ;;  %vm571_vm2 = vcmp.eq.s32.totalorder %v1947_v44, 0 }
  0x78   :  { %v764_v54 = vshll.u32 %v763_v11, 30  ;;  %v787_v31 = vsub.s32 4, %v763_v11  ;;  %vm574_vm3 = vcmp.eq.s32.totalorder %v1947_v44, 2  ;;  %vm570_vm5 = vcmp.lt.s32.totalorder %v1947_v44, 2 }
  0x79   :  { %v560_v50 = vsel %vm477_vm4, %v559_v7, %v558_v42  ;;  %vm933_vm15 = vcmp.gt.s32.totalorder %v932_v28, 0  ;;  %vm684_vm4 = vcmp.eq.s32.totalorder %v1942_v51, 0  ;;  %vm683_vm6 = vcmp.lt.s32.totalorder %v1942_v51, 2 }
  0x7a   :  { %v563_v56 = vsel %vm1891_vm10, %v1584_v4, %v560_v50  ;;  %v1949_v27 = vsub.s32 %v761_v6, %v764_v54  ;;  %v934_v57 = vsel %vm933_vm15, %v932_v28, 0  ;;  %v1966_v53 = vshll.u32 %v930_v25, 8 }
  0x7b   :  { %1476 = vcosq.f32 %v563_v56  ;;  %v936_v58 = vand.u32 31, %v934_v57  ;;  %v1964_v47 = vshrl.u32 %v934_v57, 5  ;;  %vm567_vm7 = vweird.f32 %v1584_v4 }
  0x7c   :  { %1478 = vsinq.f32 %v563_v56  ;;  %v767_v59 = vsub.s32 0, %v1949_v27  ;;  %v1975_v2 = vsel %vm703_vm0, %v787_v31, %v763_v11  ;;  %v1979_v1 = vand.u32 8388607, %v1148_v45 }
  0x7d   :  { %v937_v8 = vsub.s32 32, %v936_v58  ;;  %v939_v5 = vshll.u32 %v1541_v33, %v936_v58  ;;  %v942_v52 = vshll.u32 %v1542_v35, %v936_v58  ;;  %v945_v38 = vshll.u32 %v1543_v37, %v936_v58 }
  0x7e   :  { %v1410_v43 = vmin.u32 %v767_v59, %v1949_v27  ;;  %v1981_v14 = vadd.s32 1, %v1425_v32  ;;  %v948_v46 = vshll.u32 %v1544_v39, %v936_v58  ;;  %v951_v19 = vshll.u32 %v1545_v41, %v936_v58 }
  0x7f   :  { %v940_v61 = vshrl.u32 %v1542_v35, %v937_v8  ;;  %v943_v34 = vshrl.u32 %v1543_v37, %v937_v8  ;;  %v938_v15 = vshrl.u32 %v1541_v33, %v937_v8  ;;  %v946_v40 = vshrl.u32 %v1544_v39, %v937_v8 }
  0x80   :  { %v769_v10 = vclz %v1410_v43  ;;  %v949_v16 = vshrl.u32 %v1545_v41, %v937_v8  ;;  %v952_v30 = vshrl.u32 %v1546_v49, %v937_v8  ;;  %vm954_vm8 = vcmp.lt.s32.totalorder %v1964_v47, 1 }
  0x81   :  { %v941_v13 = vor.u32 %v940_v61, %v939_v5  ;;  %v944_v48 = vor.u32 %v943_v34, %v942_v52  ;;  %v947_v62 = vor.u32 %v946_v40, %v945_v38  ;;  %vm955_vm13 = vcmp.lt.s32.totalorder %v1964_v47, 2 }
  0x82   :  { %v1411_v24 = vadd.s32 4294967294, %v769_v10  ;;  %v950_v36 = vor.u32 %v949_v16, %v948_v46  ;;  %vm956_vm10 = vcmp.lt.s32.totalorder %v1964_v47, 3  ;;  %vm957_vm11 = vcmp.lt.s32.totalorder %v1964_v47, 4 }
  0x83   :  { %v953_v42 = vor.u32 %v952_v30, %v951_v19  ;;  %v959_v60 = vsel %vm957_vm11, %v947_v62, 2102212464  ;;  %vm1997_vm12 = vcmp.le.f32.partialorder %v701_v12, 0.7853982  ;;  %v958_v50 = vsel %vm954_vm8, %v938_v15, %v941_v13 }
  0x84   :  { %vm1412_vm9 = vcmp.lt.s32.totalorder %v1411_v24, 0  ;;  %v960_v54 = vsel %vm956_vm10, %v944_v48, %v959_v60  ;;  %v962_v58 = vsel %vm954_vm8, %v941_v13, %v944_v48  ;;  %v963_v59 = vsel %vm957_vm11, %v950_v36, 920167782 }
  0x85   :  { %v1477_v22 = vpop.eup %1476  ;;  %v772_v29 = vsel %vm1412_vm9, 0, %v1411_v24  ;;  %v964_v34 = vsel %vm956_vm10, %v947_v62, %v963_v59  ;;  %v966_v38 = vsel %vm954_vm8, %v944_v48, %v947_v62  ;;  %v967_v13 = vsel %vm957_vm11, %v953_v42, 1326507024 }
  0x86   :  { %v1479_v3 = vpop.eup %1478  ;;  %v575_v6 = vxor.u32 2147483648, %v1477_v22  ;;  %v773_v17 = vsub.s32 32, %v772_v29  ;;  %v774_v7 = vshll.u32 %v1949_v27, %v772_v29  ;;  %v777_v11 = vsub.s32 4294967266, %v772_v29 }
  0x87   :  { %v572_v63 = vxor.u32 2147483648, %v1479_v3  ;;  %v965_v4 = vsel %vm955_vm13, %v962_v58, %v964_v34  ;;  %v968_v46 = vsel %vm956_vm10, %v950_v36, %v967_v13  ;;  %v790_v19 = vsel %vm1997_vm12, 0, %v1975_v2 }
  0x88   :  { %v576_v18 = vsel %vm574_vm3, %v575_v6, %v1479_v3  ;;  %v689_v28 = vsel %vm687_vm1, %v575_v6, %v1479_v3  ;;  %v775_v56 = vshrl.u32 %v757_v9, %v773_v17  ;;  %v778_v27 = vadd.s32 127, %v777_v11 }
  0x89   :  { %v573_v12 = vsel %vm571_vm2, %v1477_v22, %v572_v63  ;;  %v686_v55 = vsel %vm684_vm4, %v1477_v22, %v572_v63  ;;  %v2037_v24 = vmul.u32.u64.low %v1966_v53, %v965_v4  ;;  %v2038_v16 = vmul.u32.u64.high %v1966_v53, %v965_v4, %v2037_v24 }
  0x8a   :  { %v577_v25 = vsel %vm570_vm5, %v573_v12, %v576_v18  ;;  %v690_v57 = vsel %vm683_vm6, %v686_v55, %v689_v28  ;;  %v776_v8 = vor.u32 %v775_v56, %v774_v7  ;;  %v779_v5 = vshll.u32 %v778_v27, 23 }
  0x8b   :  { %v578_v31 = vsel %vm567_vm7, nan, %v577_v25  ;;  %v691_v32 = vsel %vm567_vm7, nan, %v690_v57  ;;  %v961_v30 = vsel %vm955_vm13, %v958_v50, %v960_v54  ;;  %v969_v48 = vsel %vm955_vm13, %v966_v38, %v968_v46 }
  0x8c   :  { %v581_v9 = vrot.slane %v578_v31, 1  ;;  %v580_v44 = vcombine.high %v578_v31, %v578_v31  ;;  %v694_v43 = vrot.slane %v691_v32, 6  ;;  %v693_v61 = vcombine.high %v691_v32, %v691_v32 }
  0x8d   :  { %v780_v51 = vor.u32 4788187, %v779_v5  ;;  %v783_v52 = vcvt.s32.f32 %v776_v8  ;;  %vm1159_vm14 = vcmp.gt.s32.totalorder %v1981_v14, 0  ;;  %v977_v42 = vmul.u32 %v1966_v53, %v961_v30 }
  0x8e   :  { %585 = vst [vmem:[#allocation5 + $0x20] ss:$-12 sps:$4 sm:$0x83] %v581_v9   ;;  %v582_v10 = vrot.slane %v580_v44, 1  ;;  %698 = vst [vmem:[#allocation5 + $0x20] sm:$0x1c] %v694_v43  ;;  %v2050_v22 = vmul.u32.u64.low %v1966_v53, %v969_v48  ;;  %v2051_v36 = vmul.u32.u64.high %v1966_v53, %v969_v48, %v2050_v22  ;;  %vm793_vm9 = vweird.f32 %v1596_v23 }
  0x8f   :  { %v695_v15 = vrot.slane %v693_v61, 6  ;;  %v781_v40 = vand.u32 2147483647, %v780_v51  ;;  %v1160_v3 = vsel %vm1159_vm14, %v1981_v14, 0  ;;  %v980_v2 = vadd.s32 1, %v2038_v16 }
  0x90   :  { %586 = vst [vmem:[#allocation5 + $0x28] ss:$-12 sps:$4 sm:$0x83] %v582_v10   ;;  %v1162_v6 = vand.u32 31, %v1160_v3  ;;  %v1156_v60 = vor.u32 8388608, %v1979_v1  ;;  %v794_v63 = vadd.s32 3, %v790_v19  ;;  %vm979_vm15 = vc.u32 %v2051_v36, %v2037_v24 }
  0x91   :  { %699 = vst [vmem:[#allocation5 + $0x28] sm:$0x1c] %v695_v15  ;;  %v784_v62 = vmul.f32 %v783_v52, %v781_v40  ;;  %v2057_v47 = vshrl.u32 %v1160_v3, 5  ;;  %v981_v18 = vsel %vm979_vm15, %v980_v2, %v2038_v16  ;;  %vm923_vm14 = vcmp.le.f32.partialorder %v922_v0, 0.7853982 }
  0x92   :  { %v1163_v17 = vsub.s32 32, %v1162_v6  ;;  %v1165_v7 = vshll.u32 %v1541_v33, %v1162_v6  ;;  %v1168_v14 = vshll.u32 %v1542_v35, %v1162_v6  ;;  %v1171_v53 = vshll.u32 %v1543_v37, %v1162_v6 }
  0x93   :  { %v785_v29 = vxor.u32 2147483648, %v784_v62  ;;  %v1174_v50 = vshll.u32 %v1544_v39, %v1162_v6  ;;  %v982_v54 = vadd.s32 %v981_v18, %v977_v42  ;;  %v1177_v25 = vshll.u32 %v1545_v41, %v1162_v6 }
  0x94   :  { %v1166_v28 = vshrl.u32 %v1542_v35, %v1163_v17  ;;  %v1169_v12 = vshrl.u32 %v1543_v37, %v1163_v17  ;;  %v1172_v55 = vshrl.u32 %v1544_v39, %v1163_v17  ;;  %v1175_v27 = vshrl.u32 %v1545_v41, %v1163_v17 }
  0x95   :  { %v786_v11 = vsel %vm703_vm0, %v785_v29, %v784_v62  ;;  %v983_v26 = vadd.s32 536870912, %v982_v54  ;;  %v1178_v59 = vshrl.u32 %v1546_v49, %v1163_v17  ;;  %v906_v35 = vand.u32 3, %v790_v19 }
  0x96   :  { %v789_v1 = vsel %vm1997_vm12, %v1596_v23, %v786_v11  ;;  %v1167_v56 = vor.u32 %v1166_v28, %v1165_v7  ;;  %v1170_v57 = vor.u32 %v1169_v12, %v1168_v14  ;;  %v1173_v58 = vor.u32 %v1172_v55, %v1171_v53 }
  0x97   :  { %1480 = vcosq.f32 %v789_v1  ;;  %v1176_v31 = vor.u32 %v1175_v27, %v1174_v50  ;;  %vm1180_vm0 = vcmp.lt.s32.totalorder %v2057_v47, 1  ;;  %vm1182_vm1 = vcmp.lt.s32.totalorder %v2057_v47, 3 }
  0x98   :  { %1482 = vsinq.f32 %v789_v1  ;;  %v2079_v37 = vshrl.u32 %v983_v26, 30  ;;  %v1179_v39 = vor.u32 %v1178_v59, %v1177_v25  ;;  %vm1181_vm2 = vcmp.lt.s32.totalorder %v2057_v47, 2 }
  0x99   :  { %vm1183_vm3 = vcmp.lt.s32.totalorder %v2057_v47, 4  ;;  %v795_v32 = vand.u32 3, %v794_v63  ;;  %v1164_v41 = vshrl.u32 %v1541_v33, %v1163_v17  ;;  %v1188_v8 = vsel %vm1180_vm0, %v1167_v56, %v1170_v57 }
  0x9a   :  { %v1189_v49 = vsel %vm1183_vm3, %v1176_v31, 920167782  ;;  %v985_v5 = vshll.u32 %v2079_v37, 30  ;;  %v1192_v44 = vsel %vm1180_vm0, %v1170_v57, %v1173_v58  ;;  %v1196_v43 = vshll.u32 %v1156_v60, 8 }
  0x9b   :  { %v1190_v9 = vsel %vm1182_vm1, %v1173_v58, %v1189_v49  ;;  %v1185_v61 = vsel %vm1183_vm3, %v1173_v58, 2102212464  ;;  %v1193_v52 = vsel %vm1183_vm3, %v1179_v39, 1326507024  ;;  %vm908_vm4 = vcmp.eq.s32.totalorder %v906_v35, 0 }
  0x9c   :  { %v1191_v51 = vsel %vm1181_vm2, %v1188_v8, %v1190_v9  ;;  %v986_v33 = vsub.s32 %v982_v54, %v985_v5  ;;  %v1194_v34 = vsel %vm1182_vm1, %v1176_v31, %v1193_v52  ;;  %vm800_vm5 = vcmp.eq.s32.totalorder %v795_v32, 2 }
  0x9d   :  { %vm911_vm6 = vcmp.eq.s32.totalorder %v906_v35, 2  ;;  %v1184_v38 = vsel %vm1180_vm0, %v1164_v41, %v1167_v56  ;;  %v1195_v10 = vsel %vm1181_vm2, %v1192_v44, %v1194_v34  ;;  %v1186_v13 = vsel %vm1182_vm1, %v1170_v57, %v1185_v61 }
  0x9e   :  { %v988_v4 = vsub.s32 0, %v986_v33  ;;  %v2101_v40 = vmul.u32.u64.low %v1196_v43, %v1191_v51  ;;  %v2102_v46 = vmul.u32.u64.high %v1196_v43, %v1191_v51, %v2101_v40  ;;  %vm797_vm7 = vcmp.eq.s32.totalorder %v795_v32, 0 }
  0x9f   :  { %v2105_v30 = vmul.u32.u64.low %v1196_v43, %v1195_v10  ;;  %v2106_v48 = vmul.u32.u64.high %v1196_v43, %v1195_v10, %v2105_v30  ;;  %vm796_vm8 = vcmp.lt.s32.totalorder %v795_v32, 2  ;;  %vm907_vm13 = vcmp.lt.s32.totalorder %v906_v35, 2 }
  0xa0   :  { %v1418_v22 = vmin.u32 %v988_v4, %v986_v33  ;;  %v1187_v29 = vsel %vm1181_vm2, %v1184_v38, %v1186_v13  ;;  %v978_v47 = vadd.s32 %v2037_v24, %v2051_v36  ;;  %v1206_v28 = vadd.s32 1, %v2102_v46 }
  0xa1   :  { %v1481_v15 = vpop.eup %1480  ;;  %v1203_v53 = vmul.u32 %v1196_v43, %v1187_v29  ;;  %vm1205_vm10 = vc.u32 %v2106_v48, %v2101_v40  ;;  %v1008_v41 = vsub.s32 4, %v2079_v37  ;;  %vm924_vm12 = vcmp.lt.s32.totalorder %v1685_v20, 0 }
  0xa2   :  { %v1483_v16 = vpop.eup %1482  ;;  %v801_v19 = vxor.u32 2147483648, %v1481_v15  ;;  %v990_v60 = vclz %v1418_v22  ;;  %v1207_v27 = vsel %vm1205_vm10, %v1206_v28, %v2102_v46  ;;  %v1204_v10 = vadd.s32 %v2101_v40, %v2106_v48 }
  0xa3   :  { %v798_v62 = vxor.u32 2147483648, %v1483_v16  ;;  %v1208_v25 = vadd.s32 %v1207_v27, %v1203_v53  ;;  %v1009_v44 = vsel %vm924_vm12, %v1008_v41, %v2079_v37 }
  0xa4   :  { %v802_v3 = vsel %vm800_vm5, %v801_v19, %v1483_v16  ;;  %v913_v6 = vsel %vm911_vm6, %v801_v19, %v1483_v16  ;;  %v1419_v14 = vadd.s32 4294967294, %v990_v60  ;;  %v1011_v52 = vsel %vm923_vm14, 0, %v1009_v44 }
  0xa5   :  { %v799_v42 = vsel %vm797_vm7, %v1481_v15, %v798_v62  ;;  %v910_v2 = vsel %vm908_vm4, %v1481_v15, %v798_v62  ;;  %v1209_v58 = vadd.s32 536870912, %v1208_v25  ;;  %v1015_v38 = vadd.s32 3, %v1011_v52 }
  0xa6   :  { %v803_v63 = vsel %vm796_vm8, %v799_v42, %v802_v3  ;;  %v914_v17 = vsel %vm907_vm13, %v910_v2, %v913_v6  ;;  %vm1420_vm11 = vcmp.lt.s32.totalorder %v1419_v14, 0  ;;  %v1127_v37 = vand.u32 3, %v1011_v52 }
  0xa7   :  { %v804_v7 = vsel %vm793_vm9, nan, %v803_v63  ;;  %v915_v11 = vsel %vm793_vm9, nan, %v914_v17  ;;  %v993_v54 = vsel %vm1420_vm11, 0, %v1419_v14  ;;  %v2120_v24 = vshrl.u32 %v1209_v58, 30 }
  0xa8   :  { %v807_v1 = vrot.slane %v804_v7, 3  ;;  %v806_v18 = vcombine.high %v804_v7, %v804_v7  ;;  %919 = vst [vmem:[#allocation5 + $0x30] sm:$0x7] %v915_v11  ;;  %v917_v23 = vcombine.high %v915_v11, %v915_v11  ;;  %v994_v12 = vsub.s32 32, %v993_v54 }
  0xa9   :  { %v995_v55 = vshll.u32 %v986_v33, %v993_v54  ;;  %v998_v56 = vsub.s32 4294967266, %v993_v54  ;;  %v1211_v39 = vshll.u32 %v2120_v24, 30  ;;  %v1016_v46 = vand.u32 3, %v1015_v38 }
  0xaa   :  { %811 = vst [vmem:[#allocation5 + $0x20] sm:$0xe0] %v807_v1  ;;  %v808_v50 = vrot.slane %v806_v18, 3  ;;  %920 = vst [vmem:[#allocation5 + $0x38] sm:$0x7] %v917_v23  ;;  %v996_v26 = vshrl.u32 %v978_v47, %v994_v12  ;;  %vm1129_vm1 = vcmp.eq.s32.totalorder %v1127_v37, 0  ;;  %vm1014_vm6 = vweird.f32 %v1685_v20 }
  0xab   :  { %v999_v57 = vadd.s32 127, %v998_v56  ;;  %v1212_v8 = vsub.s32 %v1208_v25, %v1211_v39  ;;  %vm1021_vm0 = vcmp.eq.s32.totalorder %v1016_v46, 2  ;;  %vm1132_vm2 = vcmp.eq.s32.totalorder %v1127_v37, 2 }
  0xac   :  { %812 = vst [vmem:[#allocation5 + $0x28] sm:$0xe0] %v808_v50  ;;  %v997_v59 = vor.u32 %v996_v26, %v995_v55  ;;  %vm1018_vm3 = vcmp.eq.s32.totalorder %v1016_v46, 0  ;;  %vm1017_vm4 = vcmp.lt.s32.totalorder %v1016_v46, 2  ;;  %vm1128_vm5 = vcmp.lt.s32.totalorder %v1127_v37, 2 }
  0xad   :  { %v1000_v35 = vshll.u32 %v999_v57, 23  ;;  %v1214_v5 = vsub.s32 0, %v1212_v8  ;;  %v1234_v7 = vsub.s32 4, %v2120_v24  ;;  %vm1150_vm7 = vcmp.lt.s32.totalorder %v1688_v21, 0 }
  0xae   :  { %v1004_v31 = vcvt.s32.f32 %v997_v59  ;;  %vm1149_vm8 = vcmp.le.f32.partialorder %v1148_v45, 0.7853982 }
  0xaf   :  { %v1001_v36 = vor.u32 4788187, %v1000_v35  ;;  %v1426_v43 = vmin.u32 %v1214_v5, %v1212_v8  ;;  %v1235_v54 = vsel %vm1150_vm7, %v1234_v7, %v2120_v24 }
  0xb0   :  { %v1237_v25 = vsel %vm1149_vm8, 0, %v1235_v54 }
  0xb1   :  { %v1002_v32 = vand.u32 2147483647, %v1001_v36  ;;  %v1216_v33 = vclz %v1426_v43  ;;  %v1241_v26 = vadd.s32 3, %v1237_v25  ;;  %v1353_v58 = vand.u32 3, %v1237_v25 }
  0xb3   :  { %v1005_v49 = vmul.f32 %v1004_v31, %v1002_v32  ;;  %v1427_v34 = vadd.s32 4294967294, %v1216_v33  ;;  %v1242_v57 = vand.u32 3, %v1241_v26  ;;  %vm1358_vm9 = vcmp.eq.s32.totalorder %v1353_v58, 2 }
  0xb4   :  { %vm1355_vm11 = vcmp.eq.s32.totalorder %v1353_v58, 0 }
  0xb5   :  { %v1006_v9 = vxor.u32 2147483648, %v1005_v49  ;;  %vm1428_vm15 = vcmp.lt.s32.totalorder %v1427_v34, 0  ;;  %vm1247_vm13 = vcmp.eq.s32.totalorder %v1242_v57, 2  ;;  %vm1244_vm10 = vcmp.eq.s32.totalorder %v1242_v57, 0 }
  0xb6   :  { %v1219_v15 = vsel %vm1428_vm15, 0, %v1427_v34  ;;  %vm1240_vm15 = vweird.f32 %v1688_v21 }
  0xb7   :  { %v1007_v61 = vsel %vm924_vm12, %v1006_v9, %v1005_v49  ;;  %v1220_v4 = vsub.s32 32, %v1219_v15  ;;  %v1221_v0 = vshll.u32 %v1212_v8, %v1219_v15  ;;  %v1224_v13 = vsub.s32 4294967266, %v1219_v15 }
  0xb8   :  { %v1010_v51 = vsel %vm923_vm14, %v1685_v20, %v1007_v61  ;;  %vm1243_vm12 = vcmp.lt.s32.totalorder %v1242_v57, 2  ;;  %vm1354_vm14 = vcmp.lt.s32.totalorder %v1353_v58, 2 }
  0xb9   :  { %1484 = vcosq.f32 %v1010_v51  ;;  %v1222_v16 = vshrl.u32 %v1204_v10, %v1220_v4  ;;  %v1225_v19 = vadd.s32 127, %v1224_v13 }
  0xba   :  { %1486 = vsinq.f32 %v1010_v51 }
  0xbb   :  { %v1223_v30 = vor.u32 %v1222_v16, %v1221_v0  ;;  %v1226_v62 = vshll.u32 %v1225_v19, 23 }
  0xbd   :  { %v1227_v29 = vor.u32 4788187, %v1226_v62  ;;  %v1230_v40 = vcvt.s32.f32 %v1223_v30 }
  0xbf   :  { %v1228_v60 = vand.u32 2147483647, %v1227_v29 }
  0xc1   :  { %v1231_v53 = vmul.f32 %v1230_v40, %v1228_v60 }
  0xc3   :  { %v1485_v22 = vpop.eup %1484  ;;  %v1232_v20 = vxor.u32 2147483648, %v1231_v53 }
  0xc4   :  { %v1487_v3 = vpop.eup %1486  ;;  %v1022_v6 = vxor.u32 2147483648, %v1485_v22 }
  0xc5   :  { %v1019_v48 = vxor.u32 2147483648, %v1487_v3  ;;  %v1233_v56 = vsel %vm1150_vm7, %v1232_v20, %v1231_v53 }
  0xc6   :  { %v1023_v42 = vsel %vm1021_vm0, %v1022_v6, %v1487_v3  ;;  %v1134_v2 = vsel %vm1132_vm2, %v1022_v6, %v1487_v3  ;;  %v1236_v27 = vsel %vm1149_vm8, %v1688_v21, %v1233_v56 }
  0xc7   :  { %v1020_v63 = vsel %vm1018_vm3, %v1485_v22, %v1019_v48  ;;  %v1131_v17 = vsel %vm1129_vm1, %v1485_v22, %v1019_v48  ;;  %1488 = vcosq.f32 %v1236_v27 }
  0xc8   :  { %v1024_v11 = vsel %vm1017_vm4, %v1020_v63, %v1023_v42  ;;  %v1135_v14 = vsel %vm1128_vm5, %v1131_v17, %v1134_v2  ;;  %1490 = vsinq.f32 %v1236_v27 }
  0xc9   :  { %v1025_v1 = vsel %vm1014_vm6, nan, %v1024_v11  ;;  %v1136_v18 = vsel %vm1014_vm6, nan, %v1135_v14 }
  0xca   :  { %v1028_v23 = vrot.slane %v1025_v1, 5  ;;  %v1027_v47 = vcombine.high %v1025_v1, %v1025_v1  ;;  %v1139_v28 = vrot.slane %v1136_v18, 2  ;;  %v1138_v50 = vcombine.high %v1136_v18, %v1136_v18 }
  0xcc   :  { %1032 = vst [vmem:[#allocation5 + $0x30] sm:$0x38] %v1028_v23  ;;  %v1029_v12 = vrot.slane %v1027_v47, 5  ;;  %1143 = vst [vmem:[#allocation5 + $0x40] ss:$-12 sps:$4 sm:$0xc1] %v1139_v28  }
  0xcd   :  { %v1140_v55 = vrot.slane %v1138_v50, 2 }
  0xce   :  { %1033 = vst [vmem:[#allocation5 + $0x38] sm:$0x38] %v1029_v12 }
  0xcf   :  { %1144 = vst [vmem:[#allocation5 + $0x48] ss:$-12 sps:$4 sm:$0xc1] %v1140_v55  }
  0xd1   :  { %v1489_v59 = vpop.eup %1488 }
  0xd2   :  { %v1491_v45 = vpop.eup %1490  ;;  %v1248_v35 = vxor.u32 2147483648, %v1489_v59 }
  0xd3   :  { %v1245_v24 = vxor.u32 2147483648, %v1491_v45 }
  0xd4   :  { %v1249_v36 = vsel %vm1247_vm13, %v1248_v35, %v1491_v45  ;;  %v1360_v31 = vsel %vm1358_vm9, %v1248_v35, %v1491_v45 }
  0xd5   :  { %v1246_v39 = vsel %vm1244_vm10, %v1489_v59, %v1245_v24  ;;  %v1357_v32 = vsel %vm1355_vm11, %v1489_v59, %v1245_v24 }
  0xd6   :  { %v1250_v41 = vsel %vm1243_vm12, %v1246_v39, %v1249_v36  ;;  %v1361_v8 = vsel %vm1354_vm14, %v1357_v32, %v1360_v31 }
  0xd7   :  { %v1251_v49 = vsel %vm1240_vm15, nan, %v1250_v41  ;;  %v1362_v5 = vsel %vm1240_vm15, nan, %v1361_v8 }
  0xd8   :  { %v1254_v9 = vrot.slane %v1251_v49, 7  ;;  %v1253_v44 = vcombine.high %v1251_v49, %v1251_v49  ;;  %v1364_v43 = vcombine.low %v1362_v5, %v1362_v5  ;;  %1367 = vst [vmem:[#allocation5 + $0x48] sm:$0x70] %v1362_v5 }
  0xda   :  { %1258 = vst [vmem:[#allocation5 + $0x40] sm:$0xe] %v1254_v9  ;;  %v1255_v61 = vrot.slane %v1253_v44, 7  ;;  %1366 = vst [vmem:[#allocation5 + $0x40] sm:$0x70] %v1364_v43 }
  0xdc   :  { %1259 = vst [vmem:[#allocation5 + $0x48] sm:$0xe] %v1255_v61 }
  0xdd   :  { %1525 = shalt.err (!%p1522_p12)
}
  0xde   :  { %s1526_s22 = scalar_lea.hbm %s2152_s1, 1280 }
  0xdf   :  { %p1527_p13 = scmp.ne.s32.totalorder %s2152_s1, %s1526_s22  ;;  %p1530_p0 = scmp.lt.u32.totalorder %s1526_s22, %s2152_s1 }
  0xe1   :  { %p1532_p1 = pnand %p1530_p0, %p1527_p13 }
  0xe3   :  { %1535 = shalt.err (!%p1532_p1)
}
  0xe4   :  { %s1548_s27 = smov 256   ;;  %s1549_s28 = smov 16  }
  0xe5   :  { %1379 = dma.vmem_to_hbm [thread:$0]  %s1374_s18, 1280, %s2152_s1, [#allocation4], %s1548_s27, %s1548_s27, %s1549_s28  }
  0xe6   :  { %1538 = dma.done.wait [#allocation4], 1280  }
  0xe7   :  { %1539 = vsyncadd [#allocation4], 4294966016 }
  0xe8   :  { %1383 = vsyncpa [#allocation3], 1 }
  0xe9   :  { %1384 = vsyncpa [#allocation4], 1 }

</bundles_post_ra>
